<compile_context>
chip_gen: v5e
topology: v5e:2x2
jax: 0.10.0
libtpu: 0.0.40
codegen_flags: <defaults>
</compile_context>

<pallas_src>
import functools

import jax
import jax.numpy as jnp
from jax.experimental import pallas as pl
from jax.experimental.pallas import tpu as pltpu

LANE = 128
SUB = 8
MAX_TILE_ROWS = 2048          # 2048 x 128 x 4 B = 1 MiB per input block
NUM_SHARDS = 2                # leading "parallel" grid axis (both TCs on v7x)


def _focal_kernel(o_ref, t_ref, *rest, gamma, ignore_index, eps,
                  tile_rows, acc_rows, tiles_per_shard, rows_total,
                  has_weight):
    if has_weight:
        w_ref, loss_acc_ref, cnt_acc_ref = rest
    else:
        loss_acc_ref, cnt_acc_ref = rest

    k = pl.program_id(1)

    @pl.when(k == 0)
    def _():
        loss_acc_ref[...] = jnp.zeros_like(loss_acc_ref)
        cnt_acc_ref[...] = jnp.zeros_like(cnt_acc_ref)

    x = o_ref[...]
    t = t_ref[...]

    # Validity mask: rows past the end of the array (partial last tile or a
    # clamped duplicate tile) and ignore_index elements drop out of the mean.
    tile_idx = pl.program_id(0) * tiles_per_shard + k     # unclamped logical tile
    row_id = tile_idx * tile_rows + jax.lax.broadcasted_iota(jnp.int32, x.shape, 0)
    keep = jnp.logical_and(row_id < rows_total, t != float(ignore_index))

    prob = jnp.clip(jax.nn.sigmoid(x), eps, 1.0 - eps)
    tc = jnp.clip(t, eps, 1.0 - eps)
    pt = (1.0 - tc) * (1.0 - prob) + tc * prob
    one_m_pt = 1.0 - pt

    g = float(gamma)
    if g.is_integer() and 0 <= g <= 16:
        gi = int(g)
        if gi == 0:
            focal = jnp.ones_like(pt)
        else:
            focal = one_m_pt
            for _ in range(gi - 1):
                focal = focal * one_m_pt          # VALU; keeps the single EUP slot free
    else:
        focal = one_m_pt ** g                     # generic non-integer gamma fallback

    loss = -focal * jnp.log(pt)
    if has_weight:
        loss = loss * w_ref[...]

    masked_loss = jnp.where(keep, loss, 0.0)      # where(): garbage in OOB rows never leaks
    masked_cnt = keep.astype(jnp.float32)

    # Fold the tile into a vreg-sized (acc_rows, 128) per-lane partial sum (VALU adds).
    if acc_rows == SUB:
        loss_fold = masked_loss.reshape(tile_rows // SUB, SUB, LANE).sum(axis=0)
        cnt_fold = masked_cnt.reshape(tile_rows // SUB, SUB, LANE).sum(axis=0)
    else:
        loss_fold = jnp.sum(masked_loss, axis=0, keepdims=True)
        cnt_fold = jnp.sum(masked_cnt, axis=0, keepdims=True)

    loss_acc_ref[...] += loss_fold
    cnt_acc_ref[...] += cnt_fold


def focal_loss_2d(outputs, targets, weights=1.0, gamma=2.0,
                  ignore_index=255, eps=1e-6):
    """JAX/Pallas equivalent of FocalLoss2d.forward (returns a scalar)."""
    o = outputs.reshape(-1).astype(jnp.float32)
    t = targets.reshape(-1).astype(jnp.float32)

    scalar_weight = jnp.ndim(weights) == 0
    if not scalar_weight:
        w_arr = jnp.asarray(weights, jnp.float32)
        if w_arr.shape != outputs.shape:
            # Note: a 1-D per-class weight would broadcast against W, not C, in
            # NCHW — require an explicit full-shape weight instead.
            raise ValueError("non-scalar weights must match outputs.shape")
        w = w_arr.reshape(-1)

    n = o.shape[0]
    rows = pl.cdiv(n, LANE)
    pad = rows * LANE - n
    if pad:  # rare: only when numel is not a multiple of 128
        o = jnp.pad(o, (0, pad))
        t = jnp.pad(t, (0, pad), constant_values=float(ignore_index))
        if not scalar_weight:
            w = jnp.pad(w, (0, pad))

    o2 = o.reshape(rows, LANE)
    t2 = t.reshape(rows, LANE)

    tile_rows = min(MAX_TILE_ROWS, rows)
    acc_rows = SUB if tile_rows % SUB == 0 else 1
    total_tiles = pl.cdiv(rows, tile_rows)
    nsplit = min(NUM_SHARDS, total_tiles)
    tps = pl.cdiv(total_tiles, nsplit)
    last_tile = total_tiles - 1

    def in_map(p, k):
        # Clamp so a rectangular grid never issues a fully out-of-bounds DMA;
        # duplicated tiles are masked in-kernel via row_id >= rows_total.
        return (jnp.minimum(p * tps + k, last_tile), 0)

    tile_spec = pl.BlockSpec((tile_rows, LANE), in_map)
    acc_spec = pl.BlockSpec((None, acc_rows, LANE), lambda p, k: (p, 0, 0))
    acc_shape = jax.ShapeDtypeStruct((nsplit, acc_rows, LANE), jnp.float32)

    inputs = [o2, t2]
    in_specs = [tile_spec, tile_spec]
    if not scalar_weight:
        inputs.append(w.reshape(rows, LANE))
        in_specs.append(tile_spec)

    kernel = functools.partial(
        _focal_kernel, gamma=float(gamma), ignore_index=float(ignore_index),
        eps=float(eps), tile_rows=tile_rows, acc_rows=acc_rows,
        tiles_per_shard=tps, rows_total=rows, has_weight=not scalar_weight)

    loss_parts, cnt_parts = pl.pallas_call(
        kernel,
        out_shape=(acc_shape, acc_shape),
        grid_spec=pltpu.PrefetchScalarGridSpec(
            num_scalar_prefetch=0,
            grid=(nsplit, tps),
            in_specs=in_specs,
            out_specs=[acc_spec, acc_spec],
        ),
        compiler_params=pltpu.CompilerParams(
            dimension_semantics=("parallel", "arbitrary")),
    )(*inputs)

    loss = jnp.sum(loss_parts) / jnp.sum(cnt_parts)
    if scalar_weight:
        # A scalar weight factors out of the mean; apply it once here instead
        # of streaming a materialized broadcast weight array through HBM.
        loss = loss * jnp.asarray(weights, jnp.float32)
    return loss


def _reference(outputs, targets, weights=1.0, gamma=2.0,
               ignore_index=255, eps=1e-6):
    o = jax.nn.sigmoid(outputs).reshape(-1)
    t = targets.reshape(-1).astype(jnp.float32)
    w = jnp.broadcast_to(jnp.asarray(weights, jnp.float32),
                         outputs.shape).reshape(-1)
    keep = t != ignore_index
    o = jnp.clip(o, eps, 1.0 - eps)
    tc = jnp.clip(t, eps, 1.0 - eps)
    pt = (1.0 - tc) * (1.0 - o) + tc * o
    loss = -((1.0 - pt) ** gamma) * jnp.log(pt) * w
    return jnp.sum(jnp.where(keep, loss, 0.0)) / jnp.sum(keep.astype(jnp.float32))


def _make_inputs(key, shape):
    k1, k2, k3, k4 = jax.random.split(key, 4)
    outputs = jax.random.normal(k1, shape, dtype=jnp.float32)
    targets = jax.random.bernoulli(k2, 0.5, shape).astype(jnp.float32)
    ignore_mask = jax.random.uniform(k3, shape) < 0.1
    targets = jnp.where(ignore_mask, 255.0, targets)
    weights = jax.random.uniform(k4, shape, dtype=jnp.float32) + 0.5
    return outputs, targets, weights


if __name__ == "__main__":
    key = jax.random.PRNGKey(0)
    k_small, k_med = jax.random.split(key, 2)

    # Small NCHW case (as in the PyTorch module), default scalar weight.
    outputs, targets, weights = _make_inputs(k_small, (2, 4, 16, 16))
    loss = focal_loss_2d(outputs, targets)
    jax.block_until_ready(loss)
    ref = _reference(outputs, targets)
    assert jnp.allclose(loss, ref, rtol=1e-5, atol=1e-6), (loss, ref)

    # Per-element weight path.
    loss_w = focal_loss_2d(outputs, targets, weights)
    jax.block_until_ready(loss_w)
    ref_w = _reference(outputs, targets, weights)
    assert jnp.allclose(loss_w, ref_w, rtol=1e-5, atol=1e-6), (loss_w, ref_w)

    # Medium case exercising the multi-tile / two-shard / partial-tile masking path.
    outputs_m, targets_m, _ = _make_inputs(k_med, (3, 4, 224, 224))
    loss_m = focal_loss_2d(outputs_m, targets_m)
    jax.block_until_ready(loss_m)
    ref_m = _reference(outputs_m, targets_m)
    assert jnp.allclose(loss_m, ref_m, rtol=1e-4, atol=1e-6), (loss_m, ref_m)

    print("KERNEL_OK")
</pallas_src>

<mosaic_0001>
module attributes {stable_mosaic.version = 11 : i64} {
  func.func @_focal_kernel(%arg0: i32, %arg1: i32, %arg2: memref<16x128xf32, #tpu.memory_space<vmem>>, %arg3: memref<16x128xf32, #tpu.memory_space<vmem>>, %arg4: memref<1x8x128xf32, #tpu.memory_space<vmem>>, %arg5: memref<1x8x128xf32, #tpu.memory_space<vmem>>) attributes {dimension_semantics = [#tpu.dimension_semantics<parallel>, #tpu.dimension_semantics<arbitrary>], iteration_bounds = array<i64: 1, 1>, scalar_prefetch = 0 : i64, scratch_operands = 0 : i64, tpu.core_type = #tpu.core_type<tc>, window_params = [{transform_indices = @transform_0, window_bounds = array<i64: 16, 128>}, {transform_indices = @transform_1, window_bounds = array<i64: 16, 128>}, {transform_indices = @transform_2, window_bounds = array<i64: 1, 8, 128>}, {transform_indices = @transform_3, window_bounds = array<i64: 1, 8, 128>}]} {
    %c0_i32 = arith.constant 0 : i32
    %0 = arith.cmpi eq, %arg1, %c0_i32 : i32
    %1 = arith.extui %0 : i1 to i32
    %c0_i32_0 = arith.constant 0 : i32
    %2 = arith.cmpi ne, %1, %c0_i32_0 : i32
    scf.if %2 {
      %cst_29 = arith.constant 0.000000e+00 : f32
      %63 = vector.broadcast %cst_29 : f32 to vector<8x128xf32>
      %c0_30 = arith.constant 0 : index
      %c0_31 = arith.constant 0 : index
      %c0_32 = arith.constant 0 : index
      %64 = vector.load %arg4[%c0_30, %c0_31, %c0_32] : memref<1x8x128xf32, #tpu.memory_space<vmem>>, vector<1x8x128xf32>
      %65 = vector.shape_cast %64 : vector<1x8x128xf32> to vector<8x128xf32>
      %66 = vector.shape_cast %63 : vector<8x128xf32> to vector<1x8x128xf32>
      tpu.vector_store %arg4[%c0_30, %c0_31, %c0_32], %66 {strides = array<i32>} : memref<1x8x128xf32, #tpu.memory_space<vmem>>, vector<1x8x128xf32>,
      %cst_33 = arith.constant 0.000000e+00 : f32
      %67 = vector.broadcast %cst_33 : f32 to vector<8x128xf32>
      %c0_34 = arith.constant 0 : index
      %c0_35 = arith.constant 0 : index
      %c0_36 = arith.constant 0 : index
      %68 = vector.load %arg5[%c0_34, %c0_35, %c0_36] : memref<1x8x128xf32, #tpu.memory_space<vmem>>, vector<1x8x128xf32>
      %69 = vector.shape_cast %68 : vector<1x8x128xf32> to vector<8x128xf32>
      %70 = vector.shape_cast %67 : vector<8x128xf32> to vector<1x8x128xf32>
      tpu.vector_store %arg5[%c0_34, %c0_35, %c0_36], %70 {strides = array<i32>} : memref<1x8x128xf32, #tpu.memory_space<vmem>>, vector<1x8x128xf32>,
    } else {
    }
    %c0 = arith.constant 0 : index
    %c0_1 = arith.constant 0 : index
    %3 = vector.load %arg2[%c0, %c0_1] : memref<16x128xf32, #tpu.memory_space<vmem>>, vector<16x128xf32>
    %c0_2 = arith.constant 0 : index
    %c0_3 = arith.constant 0 : index
    %4 = vector.load %arg3[%c0_2, %c0_3] : memref<16x128xf32, #tpu.memory_space<vmem>>, vector<16x128xf32>
    %c1_i32 = arith.constant 1 : i32
    %5 = arith.muli %arg0, %c1_i32 : i32
    %6 = arith.addi %5, %arg1 : i32
    %c16_i32 = arith.constant 16 : i32
    %7 = arith.muli %6, %c16_i32 : i32
    %8 = tpu.iota {dimensions = array<i32: 0>} : vector<16x128xi32>
    %9 = vector.broadcast %7 : i32 to vector<16x128xi32>
    %10 = arith.addi %9, %8 : vector<16x128xi32>
    %c16_i32_4 = arith.constant 16 : i32
    %11 = vector.broadcast %c16_i32_4 : i32 to vector<16x128xi32>
    %12 = arith.cmpi slt, %10, %11 : vector<16x128xi32>
    %cst = arith.constant 2.550000e+02 : f32
    %13 = vector.broadcast %cst : f32 to vector<16x128xf32>
    %14 = arith.cmpf one, %4, %13 : vector<16x128xf32>
    %15 = arith.andi %12, %14 : vector<16x128xi1>
    %16 = arith.negf %3 : vector<16x128xf32>
    %17 = math.exp %16 : vector<16x128xf32>
    %cst_5 = arith.constant 1.000000e+00 : f32
    %18 = vector.broadcast %cst_5 : f32 to vector<16x128xf32>
    %19 = arith.addf %18, %17 : vector<16x128xf32>
    %20 = arith.divf %18, %19 : vector<16x128xf32>
    %cst_6 = arith.constant 9.99999997E-7 : f32
    %cst_7 = arith.constant 0.999998986 : f32
    %21 = vector.broadcast %cst_6 : f32 to vector<16x128xf32>
    %22 = arith.maximumf %21, %20 : vector<16x128xf32>
    %23 = vector.broadcast %cst_7 : f32 to vector<16x128xf32>
    %24 = arith.minimumf %23, %22 : vector<16x128xf32>
    %cst_8 = arith.constant 9.99999997E-7 : f32
    %cst_9 = arith.constant 0.999998986 : f32
    %25 = vector.broadcast %cst_8 : f32 to vector<16x128xf32>
    %26 = arith.maximumf %25, %4 : vector<16x128xf32>
    %27 = vector.broadcast %cst_9 : f32 to vector<16x128xf32>
    %28 = arith.minimumf %27, %26 : vector<16x128xf32>
    %cst_10 = arith.constant 1.000000e+00 : f32
    %29 = vector.broadcast %cst_10 : f32 to vector<16x128xf32>
    %30 = arith.subf %29, %28 : vector<16x128xf32>
    %cst_11 = arith.constant 1.000000e+00 : f32
    %31 = vector.broadcast %cst_11 : f32 to vector<16x128xf32>
    %32 = arith.subf %31, %24 : vector<16x128xf32>
    %33 = arith.mulf %30, %32 : vector<16x128xf32>
    %34 = arith.mulf %28, %24 : vector<16x128xf32>
    %35 = arith.addf %33, %34 : vector<16x128xf32>
    %cst_12 = arith.constant 1.000000e+00 : f32
    %36 = vector.broadcast %cst_12 : f32 to vector<16x128xf32>
    %37 = arith.subf %36, %35 : vector<16x128xf32>
    %38 = arith.mulf %37, %37 : vector<16x128xf32>
    %cst_13 = arith.constant 0.000000e+00 : f32
    %39 = vector.broadcast %cst_13 : f32 to vector<16x128xf32>
    %40 = arith.subf %39, %38 : vector<16x128xf32>
    %41 = math.log %35 : vector<16x128xf32>
    %42 = arith.mulf %40, %41 : vector<16x128xf32>
    %cst_14 = arith.constant 0.000000e+00 : f32
    %43 = vector.broadcast %cst_14 : f32 to vector<16x128xf32>
    %44 = arith.select %15, %42, %43 : vector<16x128xi1>, vector<16x128xf32>
    %45 = arith.extui %15 : vector<16x128xi1> to vector<16x128xi32>
    %46 = arith.sitofp %45 : vector<16x128xi32> to vector<16x128xf32>
    %47 = vector.shape_cast %44 : vector<16x128xf32> to vector<2x8x128xf32>
    %cst_15 = arith.constant dense<0.000000e+00> : vector<8x128xf32>
    %48 = vector.multi_reduction <add>, %47, %cst_15 [0] : vector<2x8x128xf32> to vector<8x128xf32>
    %49 = vector.shape_cast %46 : vector<16x128xf32> to vector<2x8x128xf32>
    %cst_16 = arith.constant dense<0.000000e+00> : vector<8x128xf32>
    %50 = vector.multi_reduction <add>, %49, %cst_16 [0] : vector<2x8x128xf32> to vector<8x128xf32>
    %c0_17 = arith.constant 0 : index
    %c0_18 = arith.constant 0 : index
    %c0_19 = arith.constant 0 : index
    %51 = vector.load %arg4[%c0_17, %c0_18, %c0_19] : memref<1x8x128xf32, #tpu.memory_space<vmem>>, vector<1x8x128xf32>
    %52 = vector.shape_cast %51 : vector<1x8x128xf32> to vector<8x128xf32>
    %53 = arith.addf %52, %48 : vector<8x128xf32>
    %c0_20 = arith.constant 0 : index
    %c0_21 = arith.constant 0 : index
    %c0_22 = arith.constant 0 : index
    %54 = vector.load %arg4[%c0_20, %c0_21, %c0_22] : memref<1x8x128xf32, #tpu.memory_space<vmem>>, vector<1x8x128xf32>
    %55 = vector.shape_cast %54 : vector<1x8x128xf32> to vector<8x128xf32>
    %56 = vector.shape_cast %53 : vector<8x128xf32> to vector<1x8x128xf32>
    tpu.vector_store %arg4[%c0_20, %c0_21, %c0_22], %56 {strides = array<i32>} : memref<1x8x128xf32, #tpu.memory_space<vmem>>, vector<1x8x128xf32>,
    %c0_23 = arith.constant 0 : index
    %c0_24 = arith.constant 0 : index
    %c0_25 = arith.constant 0 : index
    %57 = vector.load %arg5[%c0_23, %c0_24, %c0_25] : memref<1x8x128xf32, #tpu.memory_space<vmem>>, vector<1x8x128xf32>
    %58 = vector.shape_cast %57 : vector<1x8x128xf32> to vector<8x128xf32>
    %59 = arith.addf %58, %50 : vector<8x128xf32>
    %c0_26 = arith.constant 0 : index
    %c0_27 = arith.constant 0 : index
    %c0_28 = arith.constant 0 : index
    %60 = vector.load %arg5[%c0_26, %c0_27, %c0_28] : memref<1x8x128xf32, #tpu.memory_space<vmem>>, vector<1x8x128xf32>
    %61 = vector.shape_cast %60 : vector<1x8x128xf32> to vector<8x128xf32>
    %62 = vector.shape_cast %59 : vector<8x128xf32> to vector<1x8x128xf32>
    tpu.vector_store %arg5[%c0_26, %c0_27, %c0_28], %62 {strides = array<i32>} : memref<1x8x128xf32, #tpu.memory_space<vmem>>, vector<1x8x128xf32>,
    return
  }
  func.func @transform_0(%arg0: i32, %arg1: i32) -> (i32, i32) {
    %c1_i32 = arith.constant 1 : i32
    %0 = arith.muli %arg0, %c1_i32 : i32
    %1 = arith.addi %0, %arg1 : i32
    %c0_i32 = arith.constant 0 : i32
    %2 = arith.minsi %1, %c0_i32 : i32
    %c0_i32_0 = arith.constant 0 : i32
    %c0_i32_1 = arith.constant 0 : i32
    return %2, %c0_i32_0 : i32, i32
  }
  func.func @transform_1(%arg0: i32, %arg1: i32) -> (i32, i32) {
    %c1_i32 = arith.constant 1 : i32
    %0 = arith.muli %arg0, %c1_i32 : i32
    %1 = arith.addi %0, %arg1 : i32
    %c0_i32 = arith.constant 0 : i32
    %2 = arith.minsi %1, %c0_i32 : i32
    %c0_i32_0 = arith.constant 0 : i32
    %c0_i32_1 = arith.constant 0 : i32
    return %2, %c0_i32_0 : i32, i32
  }
  func.func @transform_2(%arg0: i32, %arg1: i32) -> (i32, i32, i32) {
    %c0_i32 = arith.constant 0 : i32
    %c0_i32_0 = arith.constant 0 : i32
    %c0_i32_1 = arith.constant 0 : i32
    return %arg0, %c0_i32, %c0_i32_0 : i32, i32, i32
  }
  func.func @transform_3(%arg0: i32, %arg1: i32) -> (i32, i32, i32) {
    %c0_i32 = arith.constant 0 : i32
    %c0_i32_0 = arith.constant 0 : i32
    %c0_i32_1 = arith.constant 0 : i32
    return %arg0, %c0_i32, %c0_i32_0 : i32, i32, i32
  }
}

</mosaic_0001>

<bundles_post_ra>
// kernel: tpu_custom_call.1
= control target key start
LH: loop header
LB: loop body
LE: loop exit
PB: predicated region body
PF: predicated region fallthrough
CT: control target
= control target key end

     0   :  { %9 = vsyncpa [#allocation3], 0  ;;  %s395_s0 = inlined_call_operand.hbm [shape: f32[16,128], index: 0, kind: input, shape index: {}]   ;;  %s396_s1 = inlined_call_operand.hbm [shape: f32[16,128], index: 1, kind: input, shape index: {}]   ;;  %s397_s2 = inlined_call_operand.hbm [shape: f32[1,8,128], index: 2, kind: output, shape index: {0}]   ;;  %s398_s3 = inlined_call_operand.hbm [shape: f32[1,8,128], index: 3, kind: output, shape index: {1}]  }
   0x1   :  { %10 = vsyncpa [#allocation6], 0 }
   0x2   :  { %11 = vsyncpa [#allocation4], 0 }
   0x3   :  { %12 = vsyncpa [#allocation9], 0  ;;  %s23_s14 = sshll.u32 %s395_s0, 4  ;;  %s338_s15 = smov [#allocation2]   ;;  %s24_s14 = int_to_ptr.hbm [resolvable:$true] %s23_s14 }
   0x4   :  { %s25_s16 = sshll.u32 %s338_s15, 4  ;;  %s42_s19 = sshll.u32 %s396_s1, 4  ;;  %s26_s16 = int_to_ptr.vmem [resolvable:$true] %s25_s16  ;;  %s43_s19 = int_to_ptr.hbm [resolvable:$true] %s42_s19 }
   0x5   :  { %s339_s20 = smov 128   ;;  %s340_s21 = smov 8  }
   0x6   :  { %31 = dma.hbm_to_vmem [thread:$0]  %s24_s14, 256, %s26_s16, [#allocation3], %s339_s20, %s339_s20, %s340_s21  }
   0x7   :  { %s341_s22 = smov [#allocation5]  }
   0x8   :  { %s44_s23 = sshll.u32 %s341_s22, 4  ;;  %s45_s23 = int_to_ptr.vmem [resolvable:$true] %s44_s23 }
   0x9   :  { %50 = dma.hbm_to_vmem [thread:$0]  %s43_s19, 256, %s45_s23, [#allocation6], %s339_s20, %s339_s20, %s340_s21  }
   0xa   :  { %330 = dma.done.wait [#allocation3], 256  }
   0xb   :  { %331 = vsyncadd [#allocation3], 4294967040 }
   0xc   :  { %332 = dma.done.wait [#allocation6], 256  }
   0xd   :  { %333 = vsyncadd [#allocation6], 4294967040  ;;  %v73_v0 = vld [vmem:[#allocation2] sm:$0xff]  ;;  %v74_v1 = vld [vmem:[#allocation2 + $0x8] sm:$0xff]  ;;  %v342_v13 = vmov 0.0   ;;  %s343_s0 = smov [#allocation8]  }
   0xe   :  { %v211_v2 = vmul.f32 -1.442695, %v73_v0  ;;  %v212_v3 = vmul.f32 -1.442695, %v74_v1  ;;  %v371_v8 = vld [vmem:[#allocation5] sm:$0xff]  ;;  %v373_v9 = vld [vmem:[#allocation5 + $0x8] sm:$0xff] }
   0xf   :  { %vm87_vm0 = vcmp.ne.f32.partialorder %v371_v8, 255.0  ;;  %vm88_vm1 = vcmp.ne.f32.partialorder %v373_v9, 255.0  ;;  %s189_s1 = sshll.u32 %s343_s0, 4  ;;  %s191_s26 = sshll.u32 %s398_s3, 4  ;;  %v133_v25 = vmax.f32 %v371_v8, 1e-06  ;;  %s190_s1 = int_to_ptr.vmem [resolvable:$true] %s189_s1  ;;  %s192_s26 = int_to_ptr.hbm [resolvable:$true] %s191_s26 }
  0x10   :  { %222 = vpow2.f32 %v211_v2  ;;  %v213_v14 = vsel %vm87_vm0, 1.0, %v342_v13  ;;  %v214_v15 = vsel %vm88_vm1, 1.0, %v342_v13  ;;  %v134_v28 = vmax.f32 %v373_v9, 1e-06  ;;  %s344_s3 = smov [#allocation7]   ;;  %s180_s30 = sshll.u32 %s397_s2, 4  ;;  %s181_s30 = int_to_ptr.hbm [resolvable:$true] %s180_s30 }
  0x11   :  { %224 = vpow2.f32 %v212_v3  ;;  %v166_v19 = vadd.f32 %v214_v15, %v213_v14  ;;  %v135_v33 = vmin.f32 %v133_v25, 0.999999  ;;  %s178_s27 = sshll.u32 %s344_s3, 4  ;;  %s179_s27 = int_to_ptr.vmem [resolvable:$true] %s178_s27 }
  0x12   :  { %v136_v36 = vmin.f32 %v134_v28, 0.999999 }
  0x13   :  { %172 = vst [vmem:[#allocation8] sm:$0xff] %v166_v19  ;;  %v137_v41 = vsub.f32 1.0, %v135_v33 }
  0x14   :  { %194 = dma.vmem_to_hbm [thread:$0]  %s190_s1, 128, %s192_s26, [#allocation9]   ;;  %v138_v43 = vsub.f32 1.0, %v136_v36 }
  0x16   :  { %v223_v4 = vpop.eup %222 }
  0x17   :  { %v225_v5 = vpop.eup %224  ;;  %v97_v6 = vadd.f32 1.0, %v223_v4 }
  0x18   :  { %v98_v7 = vadd.f32 1.0, %v225_v5 }
  0x19   :  { %226 = vrcp.f32 %v97_v6  ;;  %vm104_vm2 = vweird.f32 %v97_v6  ;;  %v108_v16 = vand.u32 2147483647, %v97_v6  ;;  %v110_v17 = vand.u32 2147483648, %v97_v6 }
  0x1a   :  { %228 = vrcp.f32 %v98_v7  ;;  %vm119_vm4 = vweird.f32 %v98_v7  ;;  %v125_v21 = vand.u32 2147483648, %v98_v7  ;;  %v123_v23 = vand.u32 2147483647, %v98_v7 }
  0x1b   :  { %v111_v26 = vor.u32 1.1754944e-38, %v110_v17  ;;  %vm109_vm7 = vcmp.eq.f32.partialorder %v108_v16, 8.507059e+37 }
  0x1c   :  { %v126_v30 = vor.u32 1.1754944e-38, %v125_v21  ;;  %vm124_vm9 = vcmp.eq.f32.partialorder %v123_v23, 8.507059e+37 }
  0x1f   :  { %v227_v10 = vpop.eup %226 }
  0x20   :  { %v229_v11 = vpop.eup %228  ;;  %v100_v12 = vmul.f32 %v227_v10, %v97_v6  ;;  %vm105_vm3 = vweird.f32 %v227_v10 }
  0x21   :  { %v115_v18 = vmul.f32 %v229_v11, %v98_v7  ;;  %vm120_vm5 = vweird.f32 %v229_v11  ;;  %vm106_vm6 = vmor %vm104_vm2, %vm105_vm3 }
  0x22   :  { %v101_v20 = vsub.f32 1.0, %v100_v12  ;;  %vm121_vm8 = vmor %vm119_vm4, %vm120_vm5 }
  0x23   :  { %v116_v22 = vsub.f32 1.0, %v115_v18 }
  0x24   :  { %v102_v24 = vmul.f32 %v227_v10, %v101_v20 }
  0x25   :  { %v117_v27 = vmul.f32 %v229_v11, %v116_v22 }
  0x26   :  { %v103_v29 = vadd.f32 %v227_v10, %v102_v24 }
  0x27   :  { %v118_v31 = vadd.f32 %v229_v11, %v117_v27 }
  0x28   :  { %v107_v32 = vsel %vm106_vm6, %v227_v10, %v103_v29 }
  0x29   :  { %v112_v34 = vsel %vm109_vm7, %v111_v26, %v107_v32  ;;  %v122_v35 = vsel %vm121_vm8, %v229_v11, %v118_v31 }
  0x2a   :  { %v127_v37 = vsel %vm124_vm9, %v126_v30, %v122_v35  ;;  %v129_v38 = vmax.f32 %v112_v34, 1e-06 }
  0x2b   :  { %v130_v39 = vmax.f32 %v127_v37, 1e-06 }
  0x2c   :  { %v131_v40 = vmin.f32 %v129_v38, 0.999999 }
  0x2d   :  { %v132_v42 = vmin.f32 %v130_v39, 0.999999 }
  0x2e   :  { %v139_v44 = vsub.f32 1.0, %v131_v40  ;;  %v143_v45 = vmul.f32 %v135_v33, %v131_v40 }
  0x2f   :  { %v140_v46 = vsub.f32 1.0, %v132_v42  ;;  %v144_v47 = vmul.f32 %v136_v36, %v132_v42 }
  0x30   :  { %v141_v48 = vmul.f32 %v139_v44, %v137_v41 }
  0x31   :  { %v142_v49 = vmul.f32 %v140_v46, %v138_v43 }
  0x32   :  { %v145_v50 = vadd.f32 %v143_v45, %v141_v48 }
  0x33   :  { %v146_v51 = vadd.f32 %v144_v47, %v142_v49 }
  0x34   :  { %v147_v52 = vsub.f32 1.0, %v145_v50  ;;  %230 = vlog2.f32 %v145_v50 }
  0x35   :  { %v148_v53 = vsub.f32 1.0, %v146_v51  ;;  %232 = vlog2.f32 %v146_v51 }
  0x36   :  { %v149_v54 = vmul.f32 %v147_v52, %v147_v52 }
  0x37   :  { %v150_v55 = vmul.f32 %v148_v53, %v148_v53 }
  0x38   :  { %v151_v56 = vsub.f32 0.0, %v149_v54 }
  0x39   :  { %v152_v58 = vsub.f32 0.0, %v150_v55 }
  0x3a   :  { %v231_v57 = vpop.eup %230 }
  0x3b   :  { %v233_v59 = vpop.eup %232  ;;  %v154_v60 = vmul.f32 0.6931472, %v231_v57 }
  0x3c   :  { %v156_v61 = vmul.f32 0.6931472, %v233_v59 }
  0x3d   :  { %v157_v62 = vmul.f32 %v154_v60, %v151_v56 }
  0x3e   :  { %v158_v63 = vmul.f32 %v156_v61, %v152_v58 }
  0x3f   :  { %v159_v0 = vsel %vm87_vm0, %v157_v62, 0.0 }
  0x40   :  { %v160_v1 = vsel %vm88_vm1, %v158_v63, 0.0 }
  0x41   :  { %v165_v2 = vadd.f32 %v160_v1, %v159_v0 }
  0x43   :  { %169 = vst [vmem:[#allocation7] sm:$0xff] %v165_v2 }
  0x44   :  { %183 = dma.vmem_to_hbm [thread:$0]  %s179_s27, 128, %s181_s30, [#allocation4]  }
  0x45   :  { %334 = dma.done.wait [#allocation4], 128  }
  0x46   :  { %335 = vsyncadd [#allocation4], 4294967168 }
  0x47   :  { %336 = dma.done.wait [#allocation9], 128  }
  0x48   :  { %337 = vsyncadd [#allocation9], 4294967168 }
  0x49   :  { %203 = vsyncpa [#allocation3], 1 }
  0x4a   :  { %204 = vsyncpa [#allocation6], 1 }
  0x4b   :  { %205 = vsyncpa [#allocation4], 1 }
  0x4c   :  { %206 = vsyncpa [#allocation9], 1 }

</bundles_post_ra>
